<compile_context>
chip_gen: v7x
topology: tpu7x:2x2x1
jax: 0.10.0
libtpu: 0.0.40
codegen_flags: <defaults>
</compile_context>

<pallas_src>
import functools

import jax
import jax.numpy as jnp
from jax import lax
from jax.experimental import pallas as pl
from jax.experimental.pallas import tpu as pltpu


# ---------------------------------------------------------------------------
# tiling helpers
# ---------------------------------------------------------------------------

# Per-pallas_call VMEM ceiling (double-buffered inputs + in-kernel temporaries
# + resident accumulator blocks).  Below v7x's 64 MiB physical VMEM.
_VMEM_LIMIT_BYTES = 40 * 1024 * 1024

# Per-streamed-input tile budgets (sized so inputs x 2 buffers + temporaries
# stay well under _VMEM_LIMIT_BYTES on every generation).
_GRAD_TILE_BUDGET = 4 * 1024 * 1024   # 1 streamed input
_KL_TILE_BUDGET = 3 * 1024 * 1024     # 2 streamed inputs
_NCC_TILE_BUDGET = 1 * 1024 * 1024    # 5 streamed inputs


def _pick_depth_block(d: int, hw: int, budget: int) -> int:
    """Divisor of d (multiple of 8, or d itself) whose (d_blk, hw) f32 slab fits."""
    bytes_per_row = hw * 4
    if d * bytes_per_row <= budget:
        return d
    cap = max(1, budget // bytes_per_row)
    best = None
    for cand in range(8, min(cap, d) + 1, 8):
        if d % cand == 0:
            best = cand
    if best is not None:
        return best
    for cand in range(8, d + 1, 8):      # smallest sublane-aligned divisor (over budget)
        if d % cand == 0:
            return cand
    # TODO(synk): no multiple-of-8 divisor of D; fall back to the full depth
    # (H*W tiling would be needed for truly enormous single slabs).
    return d


def _pick_batch_block(m: int, bytes_per_item: int, budget: int) -> int:
    """Largest divisor of m with m_blk * bytes_per_item <= budget (>= 1)."""
    cap = max(1, budget // max(bytes_per_item, 1))
    cap = min(cap, m)
    best = 1
    for cand in range(1, cap + 1):
        if m % cand == 0:
            best = cand
    return best


# ---------------------------------------------------------------------------
# gradient_loss (flow regularizer) — Pallas kernel
# ---------------------------------------------------------------------------

def _make_grad_kernel(penalty, d_blk, h, w, inv_nd, inv_nh, inv_nw):
    hw = h * w

    def pen(v):
        return v * v if penalty == "l2" else jnp.abs(v)

    def kernel(s_ref, acc_ref):
        # Zero this D-tile's resident (d_blk, hw) accumulator on first NC step.
        @pl.when(pl.program_id(1) == 0)
        def _init():
            acc_ref[...] = jnp.zeros_like(acc_ref)

        x = s_ref[...].astype(jnp.float32)          # (bnc, d_blk, hw)
        lane = lax.broadcasted_iota(jnp.int32, (1, 1, hw), 2)

        def add_dir(nbr, mask, inv_n):
            diff = jnp.where(mask, pen(nbr - x), 0.0)
            acc_ref[...] += jnp.sum(diff, axis=0) * inv_n   # reduce fused volumes

        if w > 1:       # neighbour at w+1: +1 along the fused lane axis
            add_dir(jnp.roll(x, -1, axis=2), (lane % w) != (w - 1), inv_nw)
        if h > 1:       # neighbour at h+1: +w along the fused lane axis
            add_dir(jnp.roll(x, -w, axis=2), lane < (hw - w), inv_nh)
        if d_blk > 1:   # neighbour at d+1 (pairs fully inside this D tile)
            row = lax.broadcasted_iota(jnp.int32, (1, d_blk, 1), 1)
            add_dir(jnp.roll(x, -1, axis=1), row < (d_blk - 1), inv_nd)

    return kernel


@functools.partial(jax.jit, static_argnames=("penalty", "tile_budget"))
def gradient_loss(s, penalty: str = "l2", tile_budget: int = _GRAD_TILE_BUDGET):
    """Pallas TPU equivalent of gradient_loss.forward(s, penalty); s: (N,C,D,H,W)."""
    n, c, d, h, w = s.shape
    nc, hw = n * c, h * w
    s3 = s.reshape(nc, d, hw)                       # zero-copy, lane-dense last dim

    d_blk = _pick_depth_block(d, hw, tile_budget)
    bnc = _pick_batch_block(nc, d_blk * hw * 4, tile_budget)
    n_dt = d // d_blk

    inv_nd = 1.0 / float(nc * max(d - 1, 1) * h * w)
    inv_nh = 1.0 / float(nc * d * max(h - 1, 1) * w)
    inv_nw = 1.0 / float(nc * d * h * max(w - 1, 1))

    acc = pl.pallas_call(
        _make_grad_kernel(penalty, d_blk, h, w, inv_nd, inv_nh, inv_nw),
        out_shape=jax.ShapeDtypeStruct((d, hw), jnp.float32),
        grid_spec=pltpu.PrefetchScalarGridSpec(
            num_scalar_prefetch=0,
            grid=(n_dt, nc // bnc),                 # D tiles outer, fused volumes inner
            in_specs=[pl.BlockSpec((bnc, d_blk, hw), lambda j, i: (i, j, 0))],
            out_specs=pl.BlockSpec((d_blk, hw), lambda j, i: (j, 0)),
        ),
        compiler_params=pltpu.CompilerParams(
            dimension_semantics=("parallel", "arbitrary"),
            vmem_limit_bytes=_VMEM_LIMIT_BYTES),
    )(s3)
    total = jnp.sum(acc)

    # d-direction pairs straddling an internal D-tile boundary: tiny XLA
    # epilogue re-reading 2*(n_dt-1) rows per volume keeps the kernel halo-free.
    if n_dt > 1 and d > 1:
        idx = jnp.arange(1, n_dt) * d_blk
        hi = jnp.take(s3, idx, axis=1).astype(jnp.float32)
        lo = jnp.take(s3, idx - 1, axis=1).astype(jnp.float32)
        diff = hi - lo
        diff = diff * diff if penalty == "l2" else jnp.abs(diff)
        total = total + jnp.sum(diff) * inv_nd

    return total / 3.0


# ---------------------------------------------------------------------------
# generic streaming "map + global sum" Pallas reduction (shared by KL and NCC)
# ---------------------------------------------------------------------------

def _make_mapsum_kernel(fn, n_in: int):
    def kernel(*refs):
        out_ref = refs[n_in]

        @pl.when(pl.program_id(1) == 0)
        def _init():
            out_ref[...] = jnp.zeros_like(out_ref)

        vals = [refs[k][...].astype(jnp.float32) for k in range(n_in)]
        out_ref[...] += jnp.sum(fn(*vals), axis=0)   # (d_blk, hw) resident accumulator

    return kernel


def _blocked_mapsum(fn, arrays, per_input_budget):
    """sum(fn(*arrays)) over all elements; arrays share one (N,C,D,H,W) shape."""
    n_, c_, d_, h_, w_ = arrays[0].shape
    nc, hw = n_ * c_, h_ * w_
    flat = [a.reshape(nc, d_, hw) for a in arrays]

    d_blk = _pick_depth_block(d_, hw, per_input_budget)
    bnc = _pick_batch_block(nc, d_blk * hw * 4, per_input_budget)
    n_dt = d_ // d_blk

    in_spec = pl.BlockSpec((bnc, d_blk, hw), lambda j, i: (i, j, 0))
    acc = pl.pallas_call(
        _make_mapsum_kernel(fn, len(flat)),
        out_shape=jax.ShapeDtypeStruct((d_, hw), jnp.float32),
        grid_spec=pltpu.PrefetchScalarGridSpec(
            num_scalar_prefetch=0,
            grid=(n_dt, nc // bnc),
            in_specs=[in_spec] * len(flat),
            out_specs=pl.BlockSpec((d_blk, hw), lambda j, i: (j, 0)),
        ),
        compiler_params=pltpu.CompilerParams(
            dimension_semantics=("parallel", "arbitrary"),
            vmem_limit_bytes=_VMEM_LIMIT_BYTES),
    )(*flat)
    return jnp.sum(acc)


# ---------------------------------------------------------------------------
# KL divergence (reduction='mean')
# ---------------------------------------------------------------------------

def _kl_elem(inp, tgt):
    # torch.nn.KLDivLoss pointwise term: xlogy(t, t) - t * x
    t_log_t = jnp.where(tgt > 0, tgt * jnp.log(jnp.where(tgt > 0, tgt, 1.0)), 0.0)
    return t_log_t - tgt * inp


@jax.jit
def kl_div_mean(inp, tgt):
    total = _blocked_mapsum(_kl_elem, [inp, tgt], _KL_TILE_BUDGET)
    return total / inp.size


# ---------------------------------------------------------------------------
# nas_ncc (local normalized cross-correlation, 9^3 window)
# ---------------------------------------------------------------------------

_NCC_WIN = 9
_NCC_WIN_SIZE = float(_NCC_WIN ** 3)


def _box_sum_1d(x, axis, win=_NCC_WIN):
    pad = win // 2
    dims = [1] * x.ndim
    dims[axis] = win
    padding = [(0, 0)] * x.ndim
    padding[axis] = (pad, pad)
    return lax.reduce_window(x, 0.0, lax.add,
                             window_dimensions=tuple(dims),
                             window_strides=(1,) * x.ndim,
                             padding=tuple(padding))


def _box_sum_3d(x):
    # Separable 9x9x9 ones-kernel box filter: 3 x 1-D passes (27 adds/voxel).
    # TODO(synk): fuse the separable sums into the Pallas mapsum kernel (D-slab
    # halo) so the five f32 box-sum volumes never round-trip HBM.
    for ax in (2, 3, 4):
        x = _box_sum_1d(x, ax)
    return x


def _ncc_cc_elem(i_sum, j_sum, i2_sum, j2_sum, ij_sum):
    ws = _NCC_WIN_SIZE
    u_i = i_sum / ws
    u_j = j_sum / ws
    cross = ij_sum - u_j * i_sum - u_i * j_sum + u_i * u_j * ws
    i_var = i2_sum - 2.0 * u_i * i_sum + u_i * u_i * ws
    j_var = j2_sum - 2.0 * u_j * j_sum + u_j * u_j * ws
    return cross * cross / (i_var * j_var + 1e-5)


@jax.jit
def nas_ncc(i_img, j_img):
    i_img = i_img.astype(jnp.float32)
    j_img = j_img.astype(jnp.float32)
    sums = [_box_sum_3d(v) for v in
            (i_img, j_img, i_img * i_img, j_img * j_img, i_img * j_img)]
    cc_total = _blocked_mapsum(_ncc_cc_elem, sums, _NCC_TILE_BUDGET)
    return -(cc_total / i_img.size)


# ---------------------------------------------------------------------------
# full module forward
# ---------------------------------------------------------------------------

@jax.jit
def loss_function_fixed_encoder_reg_kl(y, tgt, flow, warped_x_logits_sm, tgt_logits_sm):
    hyper_1, hyper_2, hyper_3 = 10.0, 15.0, 20.0
    ncc = nas_ncc(tgt, y)
    grad = gradient_loss(flow, penalty="l2")
    kl = kl_div_mean(warped_x_logits_sm, tgt_logits_sm)
    loss = hyper_1 * ncc + hyper_2 * grad + hyper_3 * kl
    return loss, ncc, grad, kl


# ---------------------------------------------------------------------------
# pure-JAX references (for correctness check)
# ---------------------------------------------------------------------------

def _ref_gradient_loss(s, penalty="l2"):
    s = s.astype(jnp.float32)
    dy = jnp.abs(s[:, :, 1:, :, :] - s[:, :, :-1, :, :])
    dx = jnp.abs(s[:, :, :, 1:, :] - s[:, :, :, :-1, :])
    dz = jnp.abs(s[:, :, :, :, 1:] - s[:, :, :, :, :-1])
    if penalty == "l2":
        dy, dx, dz = dy * dy, dx * dx, dz * dz
    return (jnp.mean(dx) + jnp.mean(dy) + jnp.mean(dz)) / 3.0


def _ref_box_sum_3d(x, win=_NCC_WIN):
    pad = win // 2
    return lax.reduce_window(
        x, 0.0, lax.add,
        window_dimensions=(1, 1, win, win, win),
        window_strides=(1, 1, 1, 1, 1),
        padding=((0, 0), (0, 0), (pad, pad), (pad, pad), (pad, pad)))


def _ref_nas_ncc(i_img, j_img):
    i_img = i_img.astype(jnp.float32)
    j_img = j_img.astype(jnp.float32)
    ws = _NCC_WIN_SIZE
    i_sum = _ref_box_sum_3d(i_img)
    j_sum = _ref_box_sum_3d(j_img)
    i2_sum = _ref_box_sum_3d(i_img * i_img)
    j2_sum = _ref_box_sum_3d(j_img * j_img)
    ij_sum = _ref_box_sum_3d(i_img * j_img)
    u_i = i_sum / ws
    u_j = j_sum / ws
    cross = ij_sum - u_j * i_sum - u_i * j_sum + u_i * u_j * ws
    i_var = i2_sum - 2 * u_i * i_sum + u_i * u_i * ws
    j_var = j2_sum - 2 * u_j * j_sum + u_j * u_j * ws
    cc = cross * cross / (i_var * j_var + 1e-5)
    return -jnp.mean(cc)


def _ref_kl(inp, tgt):
    inp = inp.astype(jnp.float32)
    tgt = tgt.astype(jnp.float32)
    return jnp.mean(jnp.where(tgt > 0, tgt * jnp.log(tgt), 0.0) - tgt * inp)


# ---------------------------------------------------------------------------
# demo / self-test
# ---------------------------------------------------------------------------

if __name__ == "__main__":
    key = jax.random.PRNGKey(0)
    k1, k2, k3, k4, k5, k6 = jax.random.split(key, 6)

    n, d, h, w = 2, 8, 16, 16
    n_cls = 4
    y = jax.random.normal(k1, (n, 1, d, h, w), dtype=jnp.float32)
    tgt = jax.random.normal(k2, (n, 1, d, h, w), dtype=jnp.float32)
    flow = jax.random.normal(k3, (n, 3, d, h, w), dtype=jnp.float32)
    warped_sm = jax.nn.softmax(
        jax.random.normal(k4, (n, n_cls, d, h, w), dtype=jnp.float32), axis=1)
    tgt_sm = jax.nn.softmax(
        jax.random.normal(k5, (n, n_cls, d, h, w), dtype=jnp.float32), axis=1)

    loss, ncc, grad, kl = jax.block_until_ready(
        loss_function_fixed_encoder_reg_kl(y, tgt, flow, warped_sm, tgt_sm))

    ref_ncc = _ref_nas_ncc(tgt, y)
    ref_grad = _ref_gradient_loss(flow, penalty="l2")
    ref_kl = _ref_kl(warped_sm, tgt_sm)
    ref_loss = 10.0 * ref_ncc + 15.0 * ref_grad + 20.0 * ref_kl

    for got, ref in ((ncc, ref_ncc), (grad, ref_grad), (kl, ref_kl), (loss, ref_loss)):
        assert jnp.allclose(got, ref, rtol=1e-3, atol=1e-5), (got, ref)

    # Extra check: force intra-volume D tiling (n_dt > 1) so the D-tile
    # boundary seam fix-up path in gradient_loss is exercised.
    flow2 = jax.random.normal(k6, (1, 3, 16, 8, 16), dtype=jnp.float32)
    grad2 = jax.block_until_ready(
        gradient_loss(flow2, penalty="l2", tile_budget=8 * 128 * 4))
    ref_grad2 = _ref_gradient_loss(flow2, penalty="l2")
    assert jnp.allclose(grad2, ref_grad2, rtol=1e-3, atol=1e-5), (grad2, ref_grad2)

    print("KERNEL_OK")
</pallas_src>

<mosaic_0001>
module attributes {stable_mosaic.version = 11 : i64} {
  func.func @kernel(%arg0: i32, %arg1: i32, %arg2: memref<2x8x256xf32, #tpu.memory_space<vmem>>, %arg3: memref<2x8x256xf32, #tpu.memory_space<vmem>>, %arg4: memref<2x8x256xf32, #tpu.memory_space<vmem>>, %arg5: memref<2x8x256xf32, #tpu.memory_space<vmem>>, %arg6: memref<2x8x256xf32, #tpu.memory_space<vmem>>, %arg7: memref<8x256xf32, #tpu.memory_space<vmem>>) attributes {dimension_semantics = [#tpu.dimension_semantics<parallel>, #tpu.dimension_semantics<arbitrary>], iteration_bounds = array<i64: 1, 1>, scalar_prefetch = 0 : i64, scratch_operands = 0 : i64, tpu.core_type = #tpu.core_type<tc>, window_params = [{transform_indices = @transform_0, window_bounds = array<i64: 2, 8, 256>}, {transform_indices = @transform_1, window_bounds = array<i64: 2, 8, 256>}, {transform_indices = @transform_2, window_bounds = array<i64: 2, 8, 256>}, {transform_indices = @transform_3, window_bounds = array<i64: 2, 8, 256>}, {transform_indices = @transform_4, window_bounds = array<i64: 2, 8, 256>}, {transform_indices = @transform_5, window_bounds = array<i64: 8, 256>}]} {
    %c0_i32 = arith.constant 0 : i32
    %0 = arith.cmpi eq, %arg1, %c0_i32 : i32
    %1 = arith.extui %0 : i1 to i32
    %c0_i32_0 = arith.constant 0 : i32
    %2 = arith.cmpi ne, %1, %c0_i32_0 : i32
    scf.if %2 {
      %cst_27 = arith.constant 0.000000e+00 : f32
      %45 = vector.broadcast %cst_27 : f32 to vector<8x256xf32>
      %c0_28 = arith.constant 0 : index
      %c0_29 = arith.constant 0 : index
      %46 = vector.load %arg7[%c0_28, %c0_29] : memref<8x256xf32, #tpu.memory_space<vmem>>, vector<8x256xf32>
      tpu.vector_store %arg7[%c0_28, %c0_29], %45 {strides = array<i32>} : memref<8x256xf32, #tpu.memory_space<vmem>>, vector<8x256xf32>,
    } else {
    }
    %c0 = arith.constant 0 : index
    %c0_1 = arith.constant 0 : index
    %c0_2 = arith.constant 0 : index
    %3 = vector.load %arg2[%c0, %c0_1, %c0_2] : memref<2x8x256xf32, #tpu.memory_space<vmem>>, vector<2x8x256xf32>
    %c0_3 = arith.constant 0 : index
    %c0_4 = arith.constant 0 : index
    %c0_5 = arith.constant 0 : index
    %4 = vector.load %arg3[%c0_3, %c0_4, %c0_5] : memref<2x8x256xf32, #tpu.memory_space<vmem>>, vector<2x8x256xf32>
    %c0_6 = arith.constant 0 : index
    %c0_7 = arith.constant 0 : index
    %c0_8 = arith.constant 0 : index
    %5 = vector.load %arg4[%c0_6, %c0_7, %c0_8] : memref<2x8x256xf32, #tpu.memory_space<vmem>>, vector<2x8x256xf32>
    %c0_9 = arith.constant 0 : index
    %c0_10 = arith.constant 0 : index
    %c0_11 = arith.constant 0 : index
    %6 = vector.load %arg5[%c0_9, %c0_10, %c0_11] : memref<2x8x256xf32, #tpu.memory_space<vmem>>, vector<2x8x256xf32>
    %c0_12 = arith.constant 0 : index
    %c0_13 = arith.constant 0 : index
    %c0_14 = arith.constant 0 : index
    %7 = vector.load %arg6[%c0_12, %c0_13, %c0_14] : memref<2x8x256xf32, #tpu.memory_space<vmem>>, vector<2x8x256xf32>
    %c0_15 = arith.constant 0 : index
    %c0_16 = arith.constant 0 : index
    %8 = vector.load %arg7[%c0_15, %c0_16] : memref<8x256xf32, #tpu.memory_space<vmem>>, vector<8x256xf32>
    %cst = arith.constant 7.290000e+02 : f32
    %9 = vector.broadcast %cst : f32 to vector<2x8x256xf32>
    %10 = arith.divf %3, %9 : vector<2x8x256xf32>
    %cst_17 = arith.constant 7.290000e+02 : f32
    %11 = vector.broadcast %cst_17 : f32 to vector<2x8x256xf32>
    %12 = arith.divf %4, %11 : vector<2x8x256xf32>
    %13 = arith.mulf %12, %3 : vector<2x8x256xf32>
    %14 = arith.subf %7, %13 : vector<2x8x256xf32>
    %15 = arith.mulf %10, %4 : vector<2x8x256xf32>
    %16 = arith.subf %14, %15 : vector<2x8x256xf32>
    %17 = arith.mulf %10, %12 : vector<2x8x256xf32>
    %cst_18 = arith.constant 7.290000e+02 : f32
    %18 = vector.broadcast %cst_18 : f32 to vector<2x8x256xf32>
    %19 = arith.mulf %17, %18 : vector<2x8x256xf32>
    %20 = arith.addf %16, %19 : vector<2x8x256xf32>
    %cst_19 = arith.constant 2.000000e+00 : f32
    %21 = vector.broadcast %cst_19 : f32 to vector<2x8x256xf32>
    %22 = arith.mulf %21, %10 : vector<2x8x256xf32>
    %23 = arith.mulf %22, %3 : vector<2x8x256xf32>
    %24 = arith.subf %5, %23 : vector<2x8x256xf32>
    %25 = arith.mulf %10, %10 : vector<2x8x256xf32>
    %cst_20 = arith.constant 7.290000e+02 : f32
    %26 = vector.broadcast %cst_20 : f32 to vector<2x8x256xf32>
    %27 = arith.mulf %25, %26 : vector<2x8x256xf32>
    %28 = arith.addf %24, %27 : vector<2x8x256xf32>
    %cst_21 = arith.constant 2.000000e+00 : f32
    %29 = vector.broadcast %cst_21 : f32 to vector<2x8x256xf32>
    %30 = arith.mulf %29, %12 : vector<2x8x256xf32>
    %31 = arith.mulf %30, %4 : vector<2x8x256xf32>
    %32 = arith.subf %6, %31 : vector<2x8x256xf32>
    %33 = arith.mulf %12, %12 : vector<2x8x256xf32>
    %cst_22 = arith.constant 7.290000e+02 : f32
    %34 = vector.broadcast %cst_22 : f32 to vector<2x8x256xf32>
    %35 = arith.mulf %33, %34 : vector<2x8x256xf32>
    %36 = arith.addf %32, %35 : vector<2x8x256xf32>
    %37 = arith.mulf %20, %20 : vector<2x8x256xf32>
    %38 = arith.mulf %28, %36 : vector<2x8x256xf32>
    %cst_23 = arith.constant 9.99999974E-6 : f32
    %39 = vector.broadcast %cst_23 : f32 to vector<2x8x256xf32>
    %40 = arith.addf %38, %39 : vector<2x8x256xf32>
    %41 = arith.divf %37, %40 : vector<2x8x256xf32>
    %cst_24 = arith.constant dense<0.000000e+00> : vector<8x256xf32>
    %42 = vector.multi_reduction <add>, %41, %cst_24 [0] : vector<2x8x256xf32> to vector<8x256xf32>
    %43 = arith.addf %8, %42 : vector<8x256xf32>
    %c0_25 = arith.constant 0 : index
    %c0_26 = arith.constant 0 : index
    %44 = vector.load %arg7[%c0_25, %c0_26] : memref<8x256xf32, #tpu.memory_space<vmem>>, vector<8x256xf32>
    tpu.vector_store %arg7[%c0_25, %c0_26], %43 {strides = array<i32>} : memref<8x256xf32, #tpu.memory_space<vmem>>, vector<8x256xf32>,
    return
  }
  func.func @transform_0(%arg0: i32, %arg1: i32) -> (i32, i32, i32) {
    %c0_i32 = arith.constant 0 : i32
    %c0_i32_0 = arith.constant 0 : i32
    return %arg1, %arg0, %c0_i32 : i32, i32, i32
  }
  func.func @transform_1(%arg0: i32, %arg1: i32) -> (i32, i32, i32) {
    %c0_i32 = arith.constant 0 : i32
    %c0_i32_0 = arith.constant 0 : i32
    return %arg1, %arg0, %c0_i32 : i32, i32, i32
  }
  func.func @transform_2(%arg0: i32, %arg1: i32) -> (i32, i32, i32) {
    %c0_i32 = arith.constant 0 : i32
    %c0_i32_0 = arith.constant 0 : i32
    return %arg1, %arg0, %c0_i32 : i32, i32, i32
  }
  func.func @transform_3(%arg0: i32, %arg1: i32) -> (i32, i32, i32) {
    %c0_i32 = arith.constant 0 : i32
    %c0_i32_0 = arith.constant 0 : i32
    return %arg1, %arg0, %c0_i32 : i32, i32, i32
  }
  func.func @transform_4(%arg0: i32, %arg1: i32) -> (i32, i32, i32) {
    %c0_i32 = arith.constant 0 : i32
    %c0_i32_0 = arith.constant 0 : i32
    return %arg1, %arg0, %c0_i32 : i32, i32, i32
  }
  func.func @transform_5(%arg0: i32, %arg1: i32) -> (i32, i32) {
    %c0_i32 = arith.constant 0 : i32
    %c0_i32_0 = arith.constant 0 : i32
    return %arg0, %c0_i32 : i32, i32
  }
}

</mosaic_0001>

<bundles_post_ra>
// kernel: nas_ncc.1
= control target key start
LH: loop header
LB: loop body
LE: loop exit
PB: predicated region body
PF: predicated region fallthrough
CT: control target
= control target key end

     0   :  { %s280_s0 = inlined_call_operand.vmem [shape: f32[2,8,256], index: 0, kind: input, shape index: {}]   ;;  %s281_s1 = inlined_call_operand.vmem [shape: f32[2,8,256], index: 1, kind: input, shape index: {}]   ;;  %s282_s2 = inlined_call_operand.vmem [shape: f32[2,8,256], index: 2, kind: input, shape index: {}]   ;;  %s283_s3 = inlined_call_operand.vmem [shape: f32[2,8,256], index: 3, kind: input, shape index: {}]   ;;  %s284_s4 = inlined_call_operand.vmem [shape: f32[2,8,256], index: 4, kind: input, shape index: {}]   ;;  %s285_s5 = inlined_call_operand.vmem [shape: f32[8,256], index: 5, kind: output, shape index: {}]  }
   0x1   :  { %v26_v0 = vld [vmem:[%s280_s0] sm:$0xff]  ;;  %v28_v1 = vld [vmem:[%s280_s0 + $0x10] sm:$0xff]  ;;  %v27_v26 = vld [vmem:[%s280_s0 + $0x8] sm:$0xff] }
   0x2   :  { %v30_v2 = vld [vmem:[%s281_s1] sm:$0xff]  ;;  %v32_v3 = vld [vmem:[%s281_s1 + $0x10] sm:$0xff]  ;;  %v49_v4 = vmul.f32 0.0013717421, %v26_v0  ;;  %v51_v5 = vmul.f32 0.0013717421, %v28_v1 }
   0x3   :  { %v53_v6 = vmul.f32 0.0013717421, %v30_v2  ;;  %v55_v8 = vmul.f32 0.0013717421, %v32_v3  ;;  %v34_v12 = vld [vmem:[%s282_s2] sm:$0xff]  ;;  %v36_v13 = vld [vmem:[%s282_s2 + $0x10] sm:$0xff] }
   0x4   :  { %v85_v7 = vmul.f32 2.0, %v49_v4  ;;  %v87_v9 = vmul.f32 2.0, %v51_v5  ;;  %v97_v10 = vmul.f32 %v49_v4, %v49_v4  ;;  %v99_v11 = vmul.f32 %v51_v5, %v51_v5  ;;  %v38_v18 = vld [vmem:[%s283_s3] sm:$0xff]  ;;  %v40_v23 = vld [vmem:[%s283_s3 + $0x10] sm:$0xff]  ;;  %v232_v27 = vld [vmem:[%s280_s0 + $0x18] sm:$0xff] }
   0x5   :  { %v109_v21 = vmul.f32 2.0, %v53_v6  ;;  %v111_v22 = vmul.f32 2.0, %v55_v8  ;;  %v121_v24 = vmul.f32 %v53_v6, %v53_v6  ;;  %v123_v25 = vmul.f32 %v55_v8, %v55_v8  ;;  %v42_v32 = vld [vmem:[%s284_s4] sm:$0xff]  ;;  %v44_v37 = vld [vmem:[%s284_s4 + $0x10] sm:$0xff]  ;;  %v31_v40 = vld [vmem:[%s281_s1 + $0x8] sm:$0xff] }
   0x6   :  { %v89_v14 = vmul.f32 %v85_v7, %v26_v0  ;;  %v91_v15 = vmul.f32 %v87_v9, %v28_v1  ;;  %v101_v16 = vmul.f32 729.0, %v97_v10  ;;  %v103_v17 = vmul.f32 729.0, %v99_v11  ;;  %v33_v48 = vld [vmem:[%s281_s1 + $0x18] sm:$0xff]  ;;  %v35_v59 = vld [vmem:[%s282_s2 + $0x8] sm:$0xff] }
   0x7   :  { %v57_v28 = vmul.f32 %v53_v6, %v26_v0  ;;  %v59_v29 = vmul.f32 %v55_v8, %v28_v1  ;;  %v113_v30 = vmul.f32 %v109_v21, %v30_v2  ;;  %v115_v31 = vmul.f32 %v111_v22, %v32_v3  ;;  %v37_v63 = vld [vmem:[%s282_s2 + $0x18] sm:$0xff] }
   0x8   :  { %v93_v19 = vsub.f32 %v34_v12, %v89_v14  ;;  %v95_v20 = vsub.f32 %v36_v13, %v91_v15  ;;  %v125_v35 = vmul.f32 729.0, %v121_v24  ;;  %v127_v36 = vmul.f32 729.0, %v123_v25 }
   0x9   :  { %v117_v38 = vsub.f32 %v38_v18, %v113_v30  ;;  %v119_v39 = vsub.f32 %v40_v23, %v115_v31  ;;  %v50_v41 = vmul.f32 0.0013717421, %v27_v26  ;;  %v244_v42 = vmul.f32 0.0013717421, %v232_v27 }
   0xa   :  { %v105_v33 = vadd.f32 %v101_v16, %v93_v19  ;;  %v107_v34 = vadd.f32 %v103_v17, %v95_v20  ;;  %v73_v43 = vmul.f32 %v53_v6, %v49_v4  ;;  %v75_v44 = vmul.f32 %v55_v8, %v51_v5  ;;  %v39_v8 = vld [vmem:[%s283_s3 + $0x8] sm:$0xff]  ;;  %v41_v17 = vld [vmem:[%s283_s3 + $0x18] sm:$0xff] }
   0xb   :  { %v65_v45 = vmul.f32 %v49_v4, %v30_v2  ;;  %v129_v46 = vadd.f32 %v125_v35, %v117_v38  ;;  %v131_v47 = vadd.f32 %v127_v36, %v119_v39  ;;  %v61_v49 = vsub.f32 %v42_v32, %v57_v28  ;;  %v43_v20 = vld [vmem:[%s284_s4 + $0x8] sm:$0xff] }
   0xc   :  { %v63_v50 = vsub.f32 %v44_v37, %v59_v29  ;;  %v67_v51 = vmul.f32 %v51_v5, %v32_v3  ;;  %v54_v52 = vmul.f32 0.0013717421, %v31_v40  ;;  %v86_v55 = vmul.f32 2.0, %v50_v41  ;;  %v45_v29 = vld [vmem:[%s284_s4 + $0x18] sm:$0xff] }
   0xd   :  { %v137_v53 = vmul.f32 %v129_v46, %v105_v33  ;;  %v139_v54 = vmul.f32 %v131_v47, %v107_v34  ;;  %v88_v56 = vmul.f32 2.0, %v244_v42  ;;  %v77_v57 = vmul.f32 729.0, %v73_v43 }
   0xe   :  { %v79_v58 = vmul.f32 729.0, %v75_v44  ;;  %v56_v60 = vmul.f32 0.0013717421, %v33_v48  ;;  %v90_v0 = vmul.f32 %v86_v55, %v27_v26  ;;  %v69_v2 = vsub.f32 %v61_v49, %v65_v45 }
   0xf   :  { %v141_v61 = vadd.f32 1e-05, %v137_v53  ;;  %v143_v62 = vadd.f32 1e-05, %v139_v54  ;;  %v92_v1 = vmul.f32 %v88_v56, %v232_v27  ;;  %v71_v3 = vsub.f32 %v63_v50, %v67_v51 }
  0x10   :  { %v98_v4 = vmul.f32 %v50_v41, %v50_v41  ;;  %v100_v5 = vmul.f32 %v244_v42, %v244_v42  ;;  %v94_v6 = vsub.f32 %v35_v59, %v90_v0  ;;  %v110_v7 = vmul.f32 2.0, %v54_v52 }
  0x11   :  { %164 = vrcp.f32 %v141_v61  ;;  %v96_v9 = vsub.f32 %v37_v63, %v92_v1  ;;  %v112_v12 = vmul.f32 2.0, %v56_v60  ;;  %v122_v14 = vmul.f32 %v54_v52, %v54_v52 }
  0x12   :  { %166 = vrcp.f32 %v143_v62  ;;  %v102_v10 = vmul.f32 729.0, %v98_v4  ;;  %v104_v11 = vmul.f32 729.0, %v100_v5  ;;  %v114_v13 = vmul.f32 %v110_v7, %v31_v40 }
  0x13   :  { %v81_v15 = vadd.f32 %v77_v57, %v69_v2  ;;  %v83_v16 = vadd.f32 %v79_v58, %v71_v3  ;;  %v58_v18 = vmul.f32 %v54_v52, %v27_v26  ;;  %v124_v19 = vmul.f32 %v56_v60, %v56_v60 }
  0x14   :  { %v106_v21 = vadd.f32 %v102_v10, %v94_v6  ;;  %v116_v22 = vmul.f32 %v112_v12, %v33_v48  ;;  %v118_v23 = vsub.f32 %v39_v8, %v114_v13  ;;  %v126_v24 = vmul.f32 729.0, %v122_v14 }
  0x15   :  { %v60_v25 = vmul.f32 %v56_v60, %v232_v27  ;;  %v128_v28 = vmul.f32 729.0, %v124_v19  ;;  %v108_v30 = vadd.f32 %v104_v11, %v96_v9  ;;  %v133_v26 = vmul.f32 %v81_v15, %v81_v15 }
  0x16   :  { %v120_v31 = vsub.f32 %v41_v17, %v116_v22  ;;  %v130_v32 = vadd.f32 %v126_v24, %v118_v23  ;;  %v62_v33 = vsub.f32 %v43_v20, %v58_v18  ;;  %v66_v34 = vmul.f32 %v50_v41, %v31_v40 }
  0x17   :  { %v74_v35 = vmul.f32 %v54_v52, %v50_v41  ;;  %v135_v36 = vmul.f32 %v83_v16, %v83_v16  ;;  %v64_v39 = vsub.f32 %v45_v29, %v60_v25  ;;  %v68_v43 = vmul.f32 %v244_v42, %v33_v48 }
  0x18   :  { %v132_v37 = vadd.f32 %v128_v28, %v120_v31  ;;  %v138_v38 = vmul.f32 %v130_v32, %v106_v21  ;;  %v76_v27 = vmul.f32 %v56_v60, %v244_v42  ;;  %v70_v50 = vsub.f32 %v62_v33, %v66_v34 }
  0x19   :  { %v78_v51 = vmul.f32 729.0, %v74_v35  ;;  %v72_v40 = vsub.f32 %v64_v39, %v68_v43 }
  0x1a   :  { %v140_v45 = vmul.f32 %v132_v37, %v108_v30  ;;  %v142_v46 = vadd.f32 1e-05, %v138_v38  ;;  %v80_v41 = vmul.f32 729.0, %v76_v27 }
  0x1b   :  { %v165_v44 = vpop.eup %164  ;;  %v82_v55 = vadd.f32 %v78_v51, %v70_v50 }
  0x1c   :  { %v167_v47 = vpop.eup %166  ;;  %v146_v49 = vmul.f32 %v165_v44, %v133_v26  ;;  %v144_v54 = vadd.f32 1e-05, %v140_v45  ;;  %168 = vrcp.f32 %v142_v46  ;;  %v84_v56 = vadd.f32 %v80_v41, %v72_v40 }
  0x1d   :  { %v150_v53 = vmul.f32 %v167_v47, %v135_v36  ;;  %v134_v42 = vmul.f32 %v82_v55, %v82_v55 }
  0x1e   :  { %170 = vrcp.f32 %v144_v54  ;;  %v136_v48 = vmul.f32 %v84_v56, %v84_v56 }
  0x1f   :  { %v153_v52 = vadd.f32 %v150_v53, %v146_v49 }
  0x21   :  { %157 = vst [vmem:[%s285_s5] sm:$0xff] %v153_v52 }
  0x26   :  { %v169_v57 = vpop.eup %168 }
  0x27   :  { %v148_v58 = vmul.f32 %v169_v57, %v134_v42 }
  0x28   :  { %v171_v59 = vpop.eup %170 }
  0x29   :  { %v152_v60 = vmul.f32 %v171_v59, %v136_v48 }
  0x2b   :  { %v154_v61 = vadd.f32 %v152_v60, %v148_v58 }
  0x2d   :  { %158 = vst [vmem:[%s285_s5 + $0x8] sm:$0xff] %v154_v61 }

</bundles_post_ra>
